<compile_context>
chip_gen: v5e
topology: v5e:2x2
jax: 0.10.0
libtpu: 0.0.40
codegen_flags: <defaults>
</compile_context>

<pallas_src>
import jax
import jax.numpy as jnp
from jax.experimental import pallas as pl
from jax.experimental.pallas import tpu as pltpu

TOTAL_RESULT_VECTOR = 5
H = 79              # true hidden width
HP = 128            # hidden width padded to full lane width
IN_DIM = 9          # input features
REP = 8             # repeat_interleave factor
XIN_DIM = IN_DIM * REP  # 72


def _round_up(n, m):
    return ((n + m - 1) // m) * m


def _mlp_kernel(x_ref,
                w29_ref, b2_ref,
                w4_ref, b4_ref,
                w5a_ref, b5_ref,
                w6_ref, b6_ref,
                w12_ref, b12_ref,
                o_ref):
    x = x_ref[...]                                    # (TB, 9) f32
    xb = x.astype(jnp.bfloat16)

    # Fused K=9 matmul: [fc2 pre-act | folded repeat_interleave term of fc5].
    t = jnp.dot(xb, w29_ref[...], preferred_element_type=jnp.float32)  # (TB, 256)
    fold = t[:, HP:]                                  # (TB, 128) f32, used at fc5

    # fc2 + relu
    h = jnp.maximum(t[:, :HP] + b2_ref[...], 0.0)

    # fc4 + relu
    h = jnp.dot(h.astype(jnp.bfloat16), w4_ref[...],
                preferred_element_type=jnp.float32) + b4_ref[...]
    h = jnp.maximum(h, 0.0)

    # cat((h, repeat_interleave(x, 8))) @ W5.T == h @ W5a + x @ W5_folded
    h = (jnp.dot(h.astype(jnp.bfloat16), w5a_ref[...],
                 preferred_element_type=jnp.float32)
         + fold + b5_ref[...])
    h = jnp.maximum(h, 0.0)

    # fc6 + relu
    h = jnp.dot(h.astype(jnp.bfloat16), w6_ref[...],
                preferred_element_type=jnp.float32) + b6_ref[...]
    h = jnp.maximum(h, 0.0)

    # fc12 + sin
    h = jnp.dot(h.astype(jnp.bfloat16), w12_ref[...],
                preferred_element_type=jnp.float32) + b12_ref[...]
    o_ref[...] = jnp.sin(h)


def _prep_weights(params):
    """Transpose to (in, out), fold repeat_interleave into W5, pad hidden->128,
    fuse the two K=9 weights, and cast weights (not biases) to bf16."""
    def pad_cols(w):  # pad output (last) dim 79 -> 128 with zeros
        return jnp.pad(w, ((0, 0), (0, HP - H)))

    def pad_rows(w):  # pad input (first) dim 79 -> 128 with zeros
        return jnp.pad(w, ((0, HP - H), (0, 0)))

    w2 = pad_cols(params["w2"].T)                               # (9, 128)
    # fold: xin @ W5b.T == x @ w5f  where  w5f[i, :] = sum_j W5b.T[8i+j, :]
    w5f = params["w5"][:, H:].T.reshape(IN_DIM, REP, H).sum(axis=1)
    w5f = pad_cols(w5f)                                         # (9, 128)
    w29 = jnp.concatenate([w2, w5f], axis=1)                    # (9, 256)

    w4 = pad_cols(pad_rows(params["w4"].T))                     # (128, 128)
    w5a = pad_cols(pad_rows(params["w5"][:, :H].T))             # (128, 128)
    w6 = pad_cols(pad_rows(params["w6"].T))                     # (128, 128)
    w12 = pad_rows(params["w12"].T)                             # (128, 5)

    def pad_b(b):
        return jnp.pad(b.reshape(1, -1), ((0, 0), (0, HP - H)))

    b2, b4, b5, b6 = (pad_b(params[k]) for k in ("b2", "b4", "b5", "b6"))
    b12 = params["b12"].reshape(1, -1)                          # (1, 5)

    bf = jnp.bfloat16
    return (w29.astype(bf), b2,
            w4.astype(bf), b4,
            w5a.astype(bf), b5,
            w6.astype(bf), b6,
            w12.astype(bf), b12)


def _vmem_budget_bytes(tb):
    """Scoped-VMEM estimate from the tile math (double-buffered x/out blocks,
    (tb,256) fused-dot temp, ~4 live (tb,128) f32 temporaries, weights)."""
    per_row = (2 * IN_DIM * 4                    # x block x2
               + 2 * TOTAL_RESULT_VECTOR * 4     # out block x2
               + 2 * HP * 4                      # (tb, 256) fused-dot temp
               + 4 * HP * 4)                     # live hidden temporaries
    weights = 1 << 20                            # resident weights + biases (generous)
    need = tb * per_row + weights + (4 << 20)    # margin
    # Clamp: >=16 MiB, and <=48 MiB so it stays inside v7x's 64 MiB physical VMEM.
    return min(max(need, 16 << 20), 48 << 20)


def network_forward(x, params, tile_b=4096):
    """x: (B, 9) float32 -> (B, 5) float32 (matches the torch forward)."""
    B = x.shape[0]
    b_ru = _round_up(B, 8)
    tb = min(_round_up(tile_b, 8), b_ru)         # batch tile, sublane-aligned
    # Keep >=2 grid steps when possible so both v7x TensorCores get work.
    if b_ru >= 16 and 2 * tb > b_ru:
        tb = _round_up(pl.cdiv(b_ru, 2), 8)
    b_pad = _round_up(B, tb)
    if b_pad != B:
        x = jnp.pad(x, ((0, b_pad - B), (0, 0)))
    grid = (b_pad // tb,)

    weights = _prep_weights(params)

    const_map = lambda i: (0, 0)                 # weights/biases stay VMEM-resident
    in_specs = [pl.BlockSpec((tb, IN_DIM), lambda i: (i, 0))] + [
        pl.BlockSpec(w.shape, const_map) for w in weights
    ]
    out_specs = pl.BlockSpec((tb, TOTAL_RESULT_VECTOR), lambda i: (i, 0))

    out = pl.pallas_call(
        _mlp_kernel,
        out_shape=jax.ShapeDtypeStruct((b_pad, TOTAL_RESULT_VECTOR), jnp.float32),
        grid=grid,
        in_specs=in_specs,
        out_specs=out_specs,
        compiler_params=pltpu.CompilerParams(
            dimension_semantics=("parallel",),   # shard batch tiles over TCs (v7x)
            vmem_limit_bytes=_vmem_budget_bytes(tb),
        ),
    )(x, *weights)
    return out[:B] if b_pad != B else out


def init_params(key):
    """Deterministic init mimicking nn.Linear (uniform +/- 1/sqrt(fan_in))."""
    def linear(k, out_dim, in_dim):
        kw, kb = jax.random.split(k)
        bound = 1.0 / jnp.sqrt(in_dim)
        w = jax.random.uniform(kw, (out_dim, in_dim), jnp.float32, -bound, bound)
        b = jax.random.uniform(kb, (out_dim,), jnp.float32, -bound, bound)
        return w, b

    k2, k4, k5, k6, k12 = jax.random.split(key, 5)
    w2, b2 = linear(k2, H, IN_DIM)
    w4, b4 = linear(k4, H, H)
    w5, b5 = linear(k5, H, H + XIN_DIM)
    w6, b6 = linear(k6, H, H)
    w12, b12 = linear(k12, TOTAL_RESULT_VECTOR, H)
    return dict(w2=w2, b2=b2, w4=w4, b4=b4, w5=w5, b5=b5,
                w6=w6, b6=b6, w12=w12, b12=b12)


def reference_forward(x, params):
    """Pure-JAX f32 reference matching the PyTorch forward exactly."""
    input_x = jnp.repeat(x, REP, axis=1)
    h = jax.nn.relu(x @ params["w2"].T + params["b2"])
    h = jax.nn.relu(h @ params["w4"].T + params["b4"])
    h = jnp.concatenate((h, input_x), axis=1)
    h = jax.nn.relu(h @ params["w5"].T + params["b5"])
    h = jax.nn.relu(h @ params["w6"].T + params["b6"])
    h = h @ params["w12"].T + params["b12"]
    return jnp.sin(h)


def mirror_forward(x, params):
    """Pure-JAX mirror of the kernel arithmetic (same bf16 operands / f32 acc,
    same folded+padded weights) for a tight numerical check."""
    (w29, b2, w4, b4, w5a, b5, w6, b6, w12, b12) = _prep_weights(params)
    xb = x.astype(jnp.bfloat16)
    t = jnp.dot(xb, w29, preferred_element_type=jnp.float32)
    fold = t[:, HP:]
    h = jnp.maximum(t[:, :HP] + b2, 0.0)
    h = jnp.maximum(jnp.dot(h.astype(jnp.bfloat16), w4,
                            preferred_element_type=jnp.float32) + b4, 0.0)
    h = jnp.maximum(jnp.dot(h.astype(jnp.bfloat16), w5a,
                            preferred_element_type=jnp.float32) + fold + b5, 0.0)
    h = jnp.maximum(jnp.dot(h.astype(jnp.bfloat16), w6,
                            preferred_element_type=jnp.float32) + b6, 0.0)
    h = jnp.dot(h.astype(jnp.bfloat16), w12,
                preferred_element_type=jnp.float32) + b12
    return jnp.sin(h)


if __name__ == "__main__":
    key = jax.random.PRNGKey(0)
    kp, kx1, kx2 = jax.random.split(key, 3)
    params = init_params(kp)

    # Small-shape check (B=4 -> padded to one 8-row tile, single grid step).
    x_small = jax.random.normal(kx1, (4, IN_DIM), dtype=jnp.float32)
    out_small = jax.block_until_ready(network_forward(x_small, params))
    assert out_small.shape == (4, TOTAL_RESULT_VECTOR)
    # Tight check vs. a pure-JAX mirror of the same bf16/f32 arithmetic.
    assert jnp.allclose(out_small, mirror_forward(x_small, params),
                        atol=2e-3, rtol=2e-3)
    # Loose sanity check vs. the exact f32 reference (bf16 operand rounding).
    assert jnp.allclose(out_small, reference_forward(x_small, params),
                        atol=1e-1, rtol=1e-1)

    # Multi-tile check exercising the batch grid / pipelining / megacore path.
    x_big = jax.random.normal(kx2, (2048, IN_DIM), dtype=jnp.float32)
    out_big = jax.block_until_ready(network_forward(x_big, params))  # tb=1024, grid=2
    assert out_big.shape == (2048, TOTAL_RESULT_VECTOR)
    assert jnp.allclose(out_big, mirror_forward(x_big, params),
                        atol=2e-3, rtol=2e-3)
    assert jnp.allclose(out_big, reference_forward(x_big, params),
                        atol=1e-1, rtol=1e-1)

    print("KERNEL_OK")
</pallas_src>

<mosaic_0001>
module attributes {stable_mosaic.version = 11 : i64} {
  func.func @_mlp_kernel(%arg0: i32, %arg1: memref<8x9xf32, #tpu.memory_space<vmem>>, %arg2: memref<9x256xbf16, #tpu.memory_space<vmem>>, %arg3: memref<1x128xf32, #tpu.memory_space<vmem>>, %arg4: memref<128x128xbf16, #tpu.memory_space<vmem>>, %arg5: memref<1x128xf32, #tpu.memory_space<vmem>>, %arg6: memref<128x128xbf16, #tpu.memory_space<vmem>>, %arg7: memref<1x128xf32, #tpu.memory_space<vmem>>, %arg8: memref<128x128xbf16, #tpu.memory_space<vmem>>, %arg9: memref<1x128xf32, #tpu.memory_space<vmem>>, %arg10: memref<128x5xbf16, #tpu.memory_space<vmem>>, %arg11: memref<1x5xf32, #tpu.memory_space<vmem>>, %arg12: memref<8x5xf32, #tpu.memory_space<vmem>>) attributes {dimension_semantics = [#tpu.dimension_semantics<parallel>], iteration_bounds = array<i64: 1>, scalar_prefetch = 0 : i64, scratch_operands = 0 : i64, tpu.core_type = #tpu.core_type<tc>, window_params = [{transform_indices = @transform_0, window_bounds = array<i64: 8, 9>}, {pipeline_mode = #tpu.pipeline_mode<synchronous>, transform_indices = @transform_1, window_bounds = array<i64: 9, 256>}, {pipeline_mode = #tpu.pipeline_mode<synchronous>, transform_indices = @transform_2, window_bounds = array<i64: 1, 128>}, {pipeline_mode = #tpu.pipeline_mode<synchronous>, transform_indices = @transform_3, window_bounds = array<i64: 128, 128>}, {pipeline_mode = #tpu.pipeline_mode<synchronous>, transform_indices = @transform_4, window_bounds = array<i64: 1, 128>}, {pipeline_mode = #tpu.pipeline_mode<synchronous>, transform_indices = @transform_5, window_bounds = array<i64: 128, 128>}, {pipeline_mode = #tpu.pipeline_mode<synchronous>, transform_indices = @transform_6, window_bounds = array<i64: 1, 128>}, {pipeline_mode = #tpu.pipeline_mode<synchronous>, transform_indices = @transform_7, window_bounds = array<i64: 128, 128>}, {pipeline_mode = #tpu.pipeline_mode<synchronous>, transform_indices = @transform_8, window_bounds = array<i64: 1, 128>}, {pipeline_mode = #tpu.pipeline_mode<synchronous>, transform_indices = @transform_9, window_bounds = array<i64: 128, 5>}, {pipeline_mode = #tpu.pipeline_mode<synchronous>, transform_indices = @transform_10, window_bounds = array<i64: 1, 5>}, {transform_indices = @transform_11, window_bounds = array<i64: 8, 5>}]} {
    %c0 = arith.constant 0 : index
    %c0_0 = arith.constant 0 : index
    %0 = vector.load %arg1[%c0, %c0_0] : memref<8x9xf32, #tpu.memory_space<vmem>>, vector<8x9xf32>
    %1 = arith.truncf %0 : vector<8x9xf32> to vector<8x9xbf16>
    %c0_1 = arith.constant 0 : index
    %c0_2 = arith.constant 0 : index
    %2 = vector.load %arg2[%c0_1, %c0_2] : memref<9x256xbf16, #tpu.memory_space<vmem>>, vector<9x256xbf16>
    %cst = arith.constant dense<0.000000e+00> : vector<8x256xf32>
    %3 = tpu.matmul %1, %2, %cst {dimension_numbers = #tpu.dot_dimension_numbers<[1], [0], [0], [1], [0, 0, 1, 1], [], []>} : vector<8x9xbf16>, vector<9x256xbf16>, vector<8x256xf32> -> vector<8x256xf32>
    %4 = vector.extract_strided_slice %3 {offsets = [0, 128], sizes = [8, 128], strides = [1, 1]} : vector<8x256xf32> to vector<8x128xf32>
    %5 = vector.extract_strided_slice %3 {offsets = [0, 0], sizes = [8, 128], strides = [1, 1]} : vector<8x256xf32> to vector<8x128xf32>
    %c0_3 = arith.constant 0 : index
    %c0_4 = arith.constant 0 : index
    %6 = vector.load %arg3[%c0_3, %c0_4] : memref<1x128xf32, #tpu.memory_space<vmem>>, vector<1x128xf32>
    %7 = vector.broadcast %6 : vector<1x128xf32> to vector<8x128xf32>
    %8 = arith.addf %5, %7 : vector<8x128xf32>
    %cst_5 = arith.constant 0.000000e+00 : f32
    %9 = vector.broadcast %cst_5 : f32 to vector<8x128xf32>
    %10 = arith.maximumf %8, %9 : vector<8x128xf32>
    %11 = arith.truncf %10 : vector<8x128xf32> to vector<8x128xbf16>
    %c0_6 = arith.constant 0 : index
    %c0_7 = arith.constant 0 : index
    %12 = vector.load %arg4[%c0_6, %c0_7] : memref<128x128xbf16, #tpu.memory_space<vmem>>, vector<128x128xbf16>
    %cst_8 = arith.constant dense<0.000000e+00> : vector<8x128xf32>
    %13 = tpu.matmul %11, %12, %cst_8 {dimension_numbers = #tpu.dot_dimension_numbers<[1], [0], [0], [1], [0, 0, 1, 1], [], []>} : vector<8x128xbf16>, vector<128x128xbf16>, vector<8x128xf32> -> vector<8x128xf32>
    %c0_9 = arith.constant 0 : index
    %c0_10 = arith.constant 0 : index
    %14 = vector.load %arg5[%c0_9, %c0_10] : memref<1x128xf32, #tpu.memory_space<vmem>>, vector<1x128xf32>
    %15 = vector.broadcast %14 : vector<1x128xf32> to vector<8x128xf32>
    %16 = arith.addf %13, %15 : vector<8x128xf32>
    %cst_11 = arith.constant 0.000000e+00 : f32
    %17 = vector.broadcast %cst_11 : f32 to vector<8x128xf32>
    %18 = arith.maximumf %16, %17 : vector<8x128xf32>
    %19 = arith.truncf %18 : vector<8x128xf32> to vector<8x128xbf16>
    %c0_12 = arith.constant 0 : index
    %c0_13 = arith.constant 0 : index
    %20 = vector.load %arg6[%c0_12, %c0_13] : memref<128x128xbf16, #tpu.memory_space<vmem>>, vector<128x128xbf16>
    %cst_14 = arith.constant dense<0.000000e+00> : vector<8x128xf32>
    %21 = tpu.matmul %19, %20, %cst_14 {dimension_numbers = #tpu.dot_dimension_numbers<[1], [0], [0], [1], [0, 0, 1, 1], [], []>} : vector<8x128xbf16>, vector<128x128xbf16>, vector<8x128xf32> -> vector<8x128xf32>
    %22 = arith.addf %21, %4 : vector<8x128xf32>
    %c0_15 = arith.constant 0 : index
    %c0_16 = arith.constant 0 : index
    %23 = vector.load %arg7[%c0_15, %c0_16] : memref<1x128xf32, #tpu.memory_space<vmem>>, vector<1x128xf32>
    %24 = vector.broadcast %23 : vector<1x128xf32> to vector<8x128xf32>
    %25 = arith.addf %22, %24 : vector<8x128xf32>
    %cst_17 = arith.constant 0.000000e+00 : f32
    %26 = vector.broadcast %cst_17 : f32 to vector<8x128xf32>
    %27 = arith.maximumf %25, %26 : vector<8x128xf32>
    %28 = arith.truncf %27 : vector<8x128xf32> to vector<8x128xbf16>
    %c0_18 = arith.constant 0 : index
    %c0_19 = arith.constant 0 : index
    %29 = vector.load %arg8[%c0_18, %c0_19] : memref<128x128xbf16, #tpu.memory_space<vmem>>, vector<128x128xbf16>
    %cst_20 = arith.constant dense<0.000000e+00> : vector<8x128xf32>
    %30 = tpu.matmul %28, %29, %cst_20 {dimension_numbers = #tpu.dot_dimension_numbers<[1], [0], [0], [1], [0, 0, 1, 1], [], []>} : vector<8x128xbf16>, vector<128x128xbf16>, vector<8x128xf32> -> vector<8x128xf32>
    %c0_21 = arith.constant 0 : index
    %c0_22 = arith.constant 0 : index
    %31 = vector.load %arg9[%c0_21, %c0_22] : memref<1x128xf32, #tpu.memory_space<vmem>>, vector<1x128xf32>
    %32 = vector.broadcast %31 : vector<1x128xf32> to vector<8x128xf32>
    %33 = arith.addf %30, %32 : vector<8x128xf32>
    %cst_23 = arith.constant 0.000000e+00 : f32
    %34 = vector.broadcast %cst_23 : f32 to vector<8x128xf32>
    %35 = arith.maximumf %33, %34 : vector<8x128xf32>
    %36 = arith.truncf %35 : vector<8x128xf32> to vector<8x128xbf16>
    %c0_24 = arith.constant 0 : index
    %c0_25 = arith.constant 0 : index
    %37 = vector.load %arg10[%c0_24, %c0_25] : memref<128x5xbf16, #tpu.memory_space<vmem>>, vector<128x5xbf16>
    %cst_26 = arith.constant dense<0.000000e+00> : vector<8x5xf32>
    %38 = tpu.matmul %36, %37, %cst_26 {dimension_numbers = #tpu.dot_dimension_numbers<[1], [0], [0], [1], [0, 0, 1, 1], [], []>} : vector<8x128xbf16>, vector<128x5xbf16>, vector<8x5xf32> -> vector<8x5xf32>
    %c0_27 = arith.constant 0 : index
    %c0_28 = arith.constant 0 : index
    %39 = vector.load %arg11[%c0_27, %c0_28] : memref<1x5xf32, #tpu.memory_space<vmem>>, vector<1x5xf32>
    %40 = vector.broadcast %39 : vector<1x5xf32> to vector<8x5xf32>
    %41 = arith.addf %38, %40 : vector<8x5xf32>
    %42 = math.sin %41 : vector<8x5xf32>
    %c0_29 = arith.constant 0 : index
    %c0_30 = arith.constant 0 : index
    %43 = vector.load %arg12[%c0_29, %c0_30] : memref<8x5xf32, #tpu.memory_space<vmem>>, vector<8x5xf32>
    tpu.vector_store %arg12[%c0_29, %c0_30], %42 {strides = array<i32>} : memref<8x5xf32, #tpu.memory_space<vmem>>, vector<8x5xf32>,
    return
  }
  func.func @transform_0(%arg0: i32) -> (i32, i32) {
    %c0_i32 = arith.constant 0 : i32
    %c0_i32_0 = arith.constant 0 : i32
    return %arg0, %c0_i32 : i32, i32
  }
  func.func @transform_1(%arg0: i32) -> (i32, i32) {
    %c0_i32 = arith.constant 0 : i32
    %c0_i32_0 = arith.constant 0 : i32
    %c0_i32_1 = arith.constant 0 : i32
    return %c0_i32, %c0_i32_0 : i32, i32
  }
  func.func @transform_2(%arg0: i32) -> (i32, i32) {
    %c0_i32 = arith.constant 0 : i32
    %c0_i32_0 = arith.constant 0 : i32
    %c0_i32_1 = arith.constant 0 : i32
    return %c0_i32, %c0_i32_0 : i32, i32
  }
  func.func @transform_3(%arg0: i32) -> (i32, i32) {
    %c0_i32 = arith.constant 0 : i32
    %c0_i32_0 = arith.constant 0 : i32
    %c0_i32_1 = arith.constant 0 : i32
    return %c0_i32, %c0_i32_0 : i32, i32
  }
  func.func @transform_4(%arg0: i32) -> (i32, i32) {
    %c0_i32 = arith.constant 0 : i32
    %c0_i32_0 = arith.constant 0 : i32
    %c0_i32_1 = arith.constant 0 : i32
    return %c0_i32, %c0_i32_0 : i32, i32
  }
  func.func @transform_5(%arg0: i32) -> (i32, i32) {
    %c0_i32 = arith.constant 0 : i32
    %c0_i32_0 = arith.constant 0 : i32
    %c0_i32_1 = arith.constant 0 : i32
    return %c0_i32, %c0_i32_0 : i32, i32
  }
  func.func @transform_6(%arg0: i32) -> (i32, i32) {
    %c0_i32 = arith.constant 0 : i32
    %c0_i32_0 = arith.constant 0 : i32
    %c0_i32_1 = arith.constant 0 : i32
    return %c0_i32, %c0_i32_0 : i32, i32
  }
  func.func @transform_7(%arg0: i32) -> (i32, i32) {
    %c0_i32 = arith.constant 0 : i32
    %c0_i32_0 = arith.constant 0 : i32
    %c0_i32_1 = arith.constant 0 : i32
    return %c0_i32, %c0_i32_0 : i32, i32
  }
  func.func @transform_8(%arg0: i32) -> (i32, i32) {
    %c0_i32 = arith.constant 0 : i32
    %c0_i32_0 = arith.constant 0 : i32
    %c0_i32_1 = arith.constant 0 : i32
    return %c0_i32, %c0_i32_0 : i32, i32
  }
  func.func @transform_9(%arg0: i32) -> (i32, i32) {
    %c0_i32 = arith.constant 0 : i32
    %c0_i32_0 = arith.constant 0 : i32
    %c0_i32_1 = arith.constant 0 : i32
    return %c0_i32, %c0_i32_0 : i32, i32
  }
  func.func @transform_10(%arg0: i32) -> (i32, i32) {
    %c0_i32 = arith.constant 0 : i32
    %c0_i32_0 = arith.constant 0 : i32
    %c0_i32_1 = arith.constant 0 : i32
    return %c0_i32, %c0_i32_0 : i32, i32
  }
  func.func @transform_11(%arg0: i32) -> (i32, i32) {
    %c0_i32 = arith.constant 0 : i32
    %c0_i32_0 = arith.constant 0 : i32
    return %arg0, %c0_i32 : i32, i32
  }
}

</mosaic_0001>

<bundles_post_ra>
// kernel: tpu_custom_call.1
= control target key start
LH: loop header
LB: loop body
LE: loop exit
PB: predicated region body
PF: predicated region fallthrough
CT: control target
= control target key end

     0   :  { %16 = vsyncpa [#allocation3], 0  ;;  %s1205_s0 = inlined_call_operand.hbm [shape: f32[8,9], index: 0, kind: input, shape index: {}]   ;;  %s1206_s1 = inlined_call_operand.hbm [shape: bf16[9,256], index: 1, kind: input, shape index: {}]   ;;  %s1207_s2 = inlined_call_operand.vmem [shape: f32[1,128], index: 2, kind: input, shape index: {}]   ;;  %s1208_s3 = inlined_call_operand.vmem [shape: bf16[128,128], index: 3, kind: input, shape index: {}]   ;;  %s1209_s4 = inlined_call_operand.vmem [shape: f32[1,128], index: 4, kind: input, shape index: {}]   ;;  %s1210_s5 = inlined_call_operand.hbm [shape: bf16[128,128], index: 5, kind: input, shape index: {}]   ;;  %s1211_s6 = inlined_call_operand.vmem [shape: f32[1,128], index: 6, kind: input, shape index: {}]   ;;  %s1212_s7 = inlined_call_operand.hbm [shape: bf16[128,128], index: 7, kind: input, shape index: {}]   ;;  %s1213_s8 = inlined_call_operand.vmem [shape: f32[1,128], index: 8, kind: input, shape index: {}]   ;;  %s1214_s9 = inlined_call_operand.vmem [shape: bf16[128,5], index: 9, kind: input, shape index: {}]   ;;  %s1215_s10 = inlined_call_operand.vmem [shape: f32[1,5], index: 10, kind: input, shape index: {}]   ;;  %s1216_s11 = inlined_call_operand.hbm [shape: f32[8,5], index: 11, kind: output, shape index: {}]  }
   0x1   :  { %17 = vsyncpa [#allocation6], 0 }
   0x2   :  { %18 = vsyncpa [#allocation9], 0  ;;  %s35_s19 = sshll.u32 %s1206_s1, 4  ;;  %s36_s19 = int_to_ptr.hbm [resolvable:$true] %s35_s19 }
   0x3   :  { %19 = vsyncpa [#allocation4], 0  ;;  %s992_s20 = smov [#allocation5]   ;;  %s25_s24 = sshll.u32 %s1205_s0, 4  ;;  %s26_s24 = int_to_ptr.hbm [resolvable:$true] %s25_s24 }
   0x4   :  { %s37_s21 = sshll.u32 %s992_s20, 4  ;;  %s993_s25 = smov 128   ;;  %s38_s21 = int_to_ptr.vmem [resolvable:$true] %s37_s21 }
   0x5   :  { %s994_s26 = smov 8   ;;  %s995_s27 = smov [#allocation2]  }
   0x6   :  { %43 = dma.hbm_to_vmem [thread:$0]  %s36_s19, 256, %s38_s21, [#allocation6], %s993_s25, %s993_s25, %s994_s26  }
   0x7   :  { %s27_s28 = sshll.u32 %s995_s27, 4  ;;  %s54_s12 = sshll.u32 %s1210_s5, 4  ;;  %s28_s28 = int_to_ptr.vmem [resolvable:$true] %s27_s28  ;;  %s55_s12 = int_to_ptr.hbm [resolvable:$true] %s54_s12 }
   0x8   :  { %30 = dma.hbm_to_vmem [thread:$0]  %s26_s24, 128, %s28_s28, [#allocation3]  }
   0x9   :  { %s996_s1 = smov [#allocation7]   ;;  %s69_s0 = sshll.u32 %s1212_s7, 4  ;;  %s70_s0 = int_to_ptr.hbm [resolvable:$true] %s69_s0 }
   0xa   :  { %s56_s13 = sshll.u32 %s996_s1, 4  ;;  %s997_s16 = smov 64   ;;  %s57_s13 = int_to_ptr.vmem [resolvable:$true] %s56_s13 }
   0xb   :  { %s998_s17 = smov 4   ;;  %s999_s18 = smov [#allocation8]  }
   0xc   :  { %62 = dma.hbm_to_vmem [thread:$0]  %s55_s12, 1024, %s57_s13, [#allocation6], %s997_s16, %s997_s16, %s998_s17  }
   0xd   :  { %s71_s19 = sshll.u32 %s999_s18, 4  ;;  %s72_s19 = int_to_ptr.vmem [resolvable:$true] %s71_s19 }
   0xe   :  { %77 = dma.hbm_to_vmem [thread:$0]  %s70_s0, 1024, %s72_s19, [#allocation9], %s997_s16, %s997_s16, %s998_s17  }
   0xf   :  { %984 = dma.done.wait [#allocation3], 128  }
  0x10   :  { %985 = vsyncadd [#allocation3], 4294967168 }
  0x11   :  { %986 = dma.done.wait [#allocation6], 1280  }
  0x12   :  { %987 = vsyncadd [#allocation6], 4294966016 }
  0x13   :  { %988 = dma.done.wait [#allocation9], 1024  }
  0x14   :  { %989 = vsyncadd [#allocation9], 4294966272  ;;  %vm117_vm0 = vcmask 1043456   ;;  %vm118_vm1 = vcmask 1044480   ;;  %v1000_v0 = vmov 65535   ;;  %v101_v6 = vld [vmem:[#allocation2] sm:$0xff] }
  0x15   :  { %v119_v1 = vsel %vm117_vm0, 4294967295, %v1000_v0  ;;  %v669_v2 = vld [vmem:[#allocation5] sm:$0xf]  ;;  %v809_v3 = vld [vmem:[#allocation5 + $0x4] sm:$0x10]  ;;  %v817_v7 = vld [vmem:[%s1208_s3 + $0x38] sm:$0xff]  ;;  %v102_v10 = vpack.c.bf16 %v101_v6, %v101_v6 }
  0x16   :  { %v120_v4 = vsel %vm118_vm1, %v119_v1, 0  ;;  %v670_v5 = vor.u32 %v809_v3, %v669_v2  ;;  %v816_v8 = vld [vmem:[%s1208_s3 + $0x30] sm:$0xff]  ;;  %228 = vmatpush.bf16.msra.mxu2 %v817_v7  ;;  %vm113_vm2 = vcmask 72704   ;;  %v815_v11 = vld [vmem:[%s1208_s3 + $0x28] sm:$0xff]  ;;  %v814_v12 = vld [vmem:[%s1208_s3 + $0x20] sm:$0xff]  ;;  %s655_s14 = sshll.u32 %s1216_s11, 4  ;;  %s656_s14 = int_to_ptr.hbm [resolvable:$true] %s655_s14 }
  0x17   :  { %v813_v13 = vld [vmem:[%s1208_s3 + $0x18] sm:$0xff]  ;;  %v812_v14 = vld [vmem:[%s1208_s3 + $0x10] sm:$0xff]  ;;  %v811_v15 = vld [vmem:[%s1208_s3 + $0x8] sm:$0xff] }
  0x18   :  { %v122_v9 = vand.u32 %v670_v5, %v120_v4  ;;  %v810_v16 = vld [vmem:[%s1208_s3] sm:$0xff]  ;;  %v825_v17 = vld [vmem:[#allocation7 + $0x38] sm:$0xff]  ;;  %v824_v18 = vld [vmem:[#allocation7 + $0x30] sm:$0xff] }
  0x19   :  { %307 = vmatpush.bf16.msra.mxu3 %v825_v17  ;;  %v823_v19 = vld [vmem:[#allocation7 + $0x28] sm:$0xff]  ;;  %v822_v20 = vld [vmem:[#allocation7 + $0x20] sm:$0xff]  ;;  %v821_v21 = vld [vmem:[#allocation7 + $0x18] sm:$0xff] }
  0x1a   :  { %134 = vmatpush.bf16.msra.mxu0 %v122_v9  ;;  %229 = vmatpush.bf16.msra.mxu2 %v816_v8  ;;  %v820_v22 = vld [vmem:[#allocation7 + $0x10] sm:$0xff]  ;;  %v859_v23 = vld [vmem:[%s1207_s2] ss:$0 sm:$0xff]  ;;  %v671_v30 = vld [vmem:[#allocation5 + $0x8] sm:$0x10] }
  0x1b   :  { %v808_v29 = vld [vmem:[#allocation5 + $0x4] sm:$0xf]  ;;  %v819_v31 = vld [vmem:[#allocation7 + $0x8] sm:$0xff]  ;;  %v818_v34 = vld [vmem:[#allocation7] sm:$0xff] }
  0x1c   :  { %v674_v32 = vor.u32 %v808_v29, %v671_v30  ;;  %v833_v35 = vld [vmem:[#allocation8 + $0x38] sm:$0xff]  ;;  %v832_v36 = vld [vmem:[#allocation8 + $0x30] sm:$0xff]  ;;  %v831_v37 = vld [vmem:[#allocation8 + $0x28] sm:$0xff] }
  0x1d   :  { %675 = vmatmul.msk.bf16.vlgmr.msra.gmra.mxu0 %vm113_vm2, %v102_v10  ;;  %308 = vmatpush.bf16.msra.mxu3 %v824_v18  ;;  %v830_v38 = vld [vmem:[#allocation8 + $0x20] sm:$0xff]  ;;  %v860_v39 = vld [vmem:[%s1209_s4] ss:$0 sm:$0xff]  ;;  %v829_v45 = vld [vmem:[#allocation8 + $0x18] sm:$0xff] }
  0x1e   :  { %230 = vmatpush.bf16.msra.mxu2 %v815_v11  ;;  %v125_v33 = vand.u32 %v674_v32, %v120_v4  ;;  %395 = vmatpush.bf16.msrb.mxu0 %v833_v35  ;;  %v828_v46 = vld [vmem:[#allocation8 + $0x10] sm:$0xff]  ;;  %v827_v49 = vld [vmem:[#allocation8 + $0x8] sm:$0xff]  ;;  %v826_v50 = vld [vmem:[#allocation8] sm:$0xff] }
  0x1f   :  { %v841_v51 = vld [vmem:[%s1214_s9 + $0x38] sm:$0xff]  ;;  %v840_v52 = vld [vmem:[%s1214_s9 + $0x30] sm:$0xff]  ;;  %v839_v53 = vld [vmem:[%s1214_s9 + $0x28] sm:$0xff] }
  0x20   :  { %147 = vmatpush.bf16.msra.mxu1 %v125_v33  ;;  %v838_v54 = vld [vmem:[%s1214_s9 + $0x20] sm:$0xff]  ;;  %v837_v55 = vld [vmem:[%s1214_s9 + $0x18] sm:$0xff]  ;;  %v836_v56 = vld [vmem:[%s1214_s9 + $0x10] sm:$0xff] }
  0x21   :  { %309 = vmatpush.bf16.msra.mxu3 %v823_v19  ;;  %v861_v57 = vld [vmem:[%s1211_s6] ss:$0 sm:$0xff]  ;;  %v835_v0 = vld [vmem:[%s1214_s9 + $0x8] sm:$0xff] }
  0x22   :  { %231 = vmatpush.bf16.msra.mxu2 %v814_v12  ;;  %396 = vmatpush.bf16.msrb.mxu0 %v832_v36  ;;  %v834_v1 = vld [vmem:[%s1214_s9] sm:$0xff] }
  0x23   :  { %676 = vmatmul.msk.bf16.vlgmr.msra.gmra.mxu1 %vm113_vm2, %v102_v10  ;;  %v862_v2 = vld [vmem:[%s1213_s8] ss:$0 sm:$0xff]  ;;  %s1008_s8 = smov [#allocation10]  }
  0x24   :  { %478 = vmatpush.bf16.msrb.mxu1 %v841_v51  ;;  %v863_v8 = vld [vmem:[%s1215_s10] ss:$0 sm:$0xff]  ;;  %s653_s9 = sshll.u32 %s1008_s8, 4  ;;  %s654_s9 = int_to_ptr.vmem [resolvable:$true] %s653_s9 }
  0x25   :  { %310 = vmatpush.bf16.msra.mxu3 %v822_v20 }
  0x26   :  { %232 = vmatpush.bf16.msra.mxu2 %v813_v13  ;;  %397 = vmatpush.bf16.msrb.mxu0 %v831_v37  ;;  %v1006_v37 = vmov 1326507024  }
  0x28   :  { %479 = vmatpush.bf16.msrb.mxu1 %v840_v52 }
  0x29   :  { %311 = vmatpush.bf16.msra.mxu3 %v821_v21 }
  0x2a   :  { %233 = vmatpush.bf16.msra.mxu2 %v812_v14  ;;  %398 = vmatpush.bf16.msrb.mxu0 %v830_v38 }
  0x2c   :  { %480 = vmatpush.bf16.msrb.mxu1 %v839_v53 }
  0x2d   :  { %312 = vmatpush.bf16.msra.mxu3 %v820_v22 }
  0x2e   :  { %234 = vmatpush.bf16.msra.mxu2 %v811_v15  ;;  %399 = vmatpush.bf16.msrb.mxu0 %v829_v45 }
  0x30   :  { %481 = vmatpush.bf16.msrb.mxu1 %v838_v54 }
  0x31   :  { %313 = vmatpush.bf16.msra.mxu3 %v819_v31  ;;  %v1004_v31 = vmov 2102212464  }
  0x32   :  { %235 = vmatpush.bf16.msra.mxu2 %v810_v16  ;;  %400 = vmatpush.bf16.msrb.mxu0 %v828_v46 }
  0x34   :  { %482 = vmatpush.bf16.msrb.mxu1 %v837_v55 }
  0x35   :  { %314 = vmatpush.bf16.msra.mxu3 %v818_v34  ;;  %v1005_v34 = vmov 920167782  }
  0x36   :  { %401 = vmatpush.bf16.msrb.mxu0 %v827_v49 }
  0x38   :  { %483 = vmatpush.bf16.msrb.mxu1 %v836_v56 }
  0x3a   :  { %402 = vmatpush.bf16.msrb.mxu0 %v826_v50 }
  0x3c   :  { %484 = vmatpush.bf16.msrb.mxu1 %v835_v0 }
  0x40   :  { %485 = vmatpush.bf16.msrb.mxu1 %v834_v1 }
  0x9a   :  { %v136_v24 = vpop.f32.mrf.mxu0 }
  0x9b   :  { %v157_v25 = vadd.f32 %v859_v23, %v136_v24  ;;  %v1001_v23 = vmov 683565275  }
  0x9d   :  { %v158_v26 = vmax.f32 %v157_v25, 0.0  ;;  %v1002_v25 = vmov 2475754826  }
  0x9f   :  { %v159_v27 = vpack.c.bf16 %v158_v26, %v158_v26 }
  0xa0   :  { %v149_v47 = vpop.f32.mrf.mxu1 }
  0xa1   :  { %236 = vmatmul.bf16.vlgmr.msra.gmra.mxu2 %v159_v27 }
  0xa2   :  { %v138_v28 = vpop.f32.mrf.mxu0 }
  0xa3   :  { %v1003_v28 = vmov 2131351028  }
  0xa8   :  { %v151_v48 = vpop.f32.mrf.mxu1 }
 0x124   :  { %v237_v40 = vpop.f32.mrf.mxu2 }
 0x125   :  { %v238_v41 = vadd.f32 %v860_v39, %v237_v40 }
 0x127   :  { %v241_v42 = vmax.f32 %v238_v41, 0.0 }
 0x129   :  { %v242_v43 = vpack.c.bf16 %v241_v42, %v241_v42 }
 0x12b   :  { %315 = vmatmul.bf16.vlgmr.msra.gmra.mxu3 %v242_v43 }
 0x12c   :  { %v239_v44 = vpop.f32.mrf.mxu2 }
 0x1ae   :  { %v316_v58 = vpop.f32.mrf.mxu3 }
 0x1af   :  { %v317_v59 = vadd.f32 %v316_v58, %v149_v47 }
 0x1b1   :  { %v324_v60 = vadd.f32 %v861_v57, %v317_v59 }
 0x1b3   :  { %v325_v61 = vmax.f32 %v324_v60, 0.0 }
 0x1b5   :  { %v326_v62 = vpack.c.bf16 %v325_v61, %v325_v61 }
 0x1b6   :  { %v318_v63 = vpop.f32.mrf.mxu3 }
 0x1b7   :  { %403 = vmatmul.bf16.vlgmr.msrb.gmra.mxu0 %v326_v62 }
 0x234   :  { %v404_v3 = vpop.f32.mrf.mxu0 }
 0x235   :  { %v405_v4 = vadd.f32 %v862_v2, %v404_v3 }
 0x237   :  { %v408_v5 = vmax.f32 %v405_v4, 0.0 }
 0x239   :  { %v409_v6 = vpack.c.bf16 %v408_v5, %v408_v5 }
 0x23b   :  { %486 = vmatmul.bf16.vlgmr.msrb.gmra.mxu1 %v409_v6 }
 0x23c   :  { %v406_v7 = vpop.f32.mrf.mxu0 }
 0x23d   :  { %v1007_v7 = vmov 0  }
 0x2b8   :  { %v487_v9 = vpop.f32.mrf.mxu1 }
 0x2b9   :  { %v1146_v10 = vadd.f32 %v863_v8, %v487_v9 }
 0x2bb   :  { %v494_v11 = vand.u32 2139095040, %v1146_v10  ;;  %v491_v14 = vand.u32 2147483647, %v1146_v10  ;;  %vm493_vm15 = vcmp.lt.s32.totalorder %v1146_v10, 0 }
 0x2bd   :  { %v495_v12 = vshrl.u32 %v494_v11, 23  ;;  %v498_v17 = vand.u32 8388607, %v491_v14  ;;  %vm492_vm0 = vcmp.le.f32.partialorder %v491_v14, 0.7853982 }
 0x2bf   :  { %v805_v13 = vadd.s32 4294967169, %v495_v12  ;;  %v499_v21 = vor.u32 8388608, %v498_v17 }
 0x2c0   :  { %v489_v15 = vpop.f32.mrf.mxu1 }
 0x2c1   :  { %v501_v16 = vadd.s32 1, %v805_v13  ;;  %v1163_v44 = vshll.u32 %v499_v21, 8 }
 0x2c3   :  { %vm502_vm3 = vcmp.gt.s32.totalorder %v501_v16, 0  ;;  %v540_v53 = vand.u32 65535, %v1163_v44  ;;  %v541_v54 = vshrl.u32 %v1163_v44, 16 }
 0x2c4   :  { %v503_v18 = vsel %vm502_vm3, %v501_v16, 0 }
 0x2c5   :  { %v505_v19 = vand.u32 31, %v503_v18  ;;  %v1154_v22 = vshrl.u32 %v503_v18, 5 }
 0x2c7   :  { %v1152_v20 = vsub.s32 32, %v505_v19  ;;  %v508_v24 = vshll.u32 %v1001_v23, %v505_v19  ;;  %v511_v26 = vshll.u32 %v1002_v25, %v505_v19  ;;  %v514_v30 = vshll.u32 %v1003_v28, %v505_v19 }
 0x2c8   :  { %v517_v33 = vshll.u32 %v1004_v31, %v505_v19  ;;  %v520_v36 = vshll.u32 %v1005_v34, %v505_v19  ;;  %vm523_vm4 = vcmp.lt.s32.totalorder %v1154_v22, 1  ;;  %vm526_vm5 = vcmp.lt.s32.totalorder %v1154_v22, 4 }
 0x2c9   :  { %v509_v27 = vshrl.u32 %v1002_v25, %v1152_v20  ;;  %v512_v29 = vshrl.u32 %v1003_v28, %v1152_v20  ;;  %v515_v32 = vshrl.u32 %v1004_v31, %v1152_v20  ;;  %v518_v35 = vshrl.u32 %v1005_v34, %v1152_v20 }
 0x2ca   :  { %v521_v38 = vshrl.u32 %v1006_v37, %v1152_v20  ;;  %vm525_vm6 = vcmp.lt.s32.totalorder %v1154_v22, 3  ;;  %vm524_vm7 = vcmp.lt.s32.totalorder %v1154_v22, 2  ;;  %v507_v18 = vshrl.u32 %v1001_v23, %v1152_v20 }
 0x2cb   :  { %v510_v39 = vor.u32 %v509_v27, %v508_v24  ;;  %v513_v40 = vor.u32 %v512_v29, %v511_v26  ;;  %v516_v41 = vor.u32 %v515_v32, %v514_v30  ;;  %v519_v42 = vor.u32 %v518_v35, %v517_v33 }
 0x2cc   :  { %v522_v43 = vor.u32 %v521_v38, %v520_v36 }
 0x2cd   :  { %v531_v45 = vsel %vm523_vm4, %v510_v39, %v513_v40  ;;  %v535_v46 = vsel %vm523_vm4, %v513_v40, %v516_v41  ;;  %v532_v47 = vsel %vm526_vm5, %v519_v42, 920167782  ;;  %v528_v15 = vsel %vm526_vm5, %v516_v41, 2102212464 }
 0x2ce   :  { %v536_v48 = vsel %vm526_vm5, %v522_v43, 1326507024  ;;  %v533_v49 = vsel %vm525_vm6, %v516_v41, %v532_v47  ;;  %v527_v27 = vsel %vm523_vm4, %v507_v18, %v510_v39  ;;  %v529_v28 = vsel %vm525_vm6, %v513_v40, %v528_v15 }
 0x2cf   :  { %v537_v50 = vsel %vm525_vm6, %v519_v42, %v536_v48  ;;  %v534_v51 = vsel %vm524_vm7, %v531_v45, %v533_v49  ;;  %v530_v20 = vsel %vm524_vm7, %v527_v27, %v529_v28  ;;  %vm646_vm4 = vcmask 39936  }
 0x2d0   :  { %v538_v52 = vsel %vm524_vm7, %v535_v46, %v537_v50  ;;  %v564_v57 = vand.u32 65535, %v534_v51  ;;  %v565_v58 = vshrl.u32 %v534_v51, 16  ;;  %v584_v36 = vmul.u32 %v1163_v44, %v530_v20 }
 0x2d1   :  { %v542_v55 = vand.u32 65535, %v538_v52  ;;  %v543_v56 = vshrl.u32 %v538_v52, 16  ;;  %vm634_vm5 = vweird.f32 %v1146_v10 }
 0x2d2   :  { %v567_v61 = vmul.u32 %v565_v58, %v540_v53  ;;  %v568_v62 = vmul.u32 %v564_v57, %v541_v54  ;;  %v566_v2 = vmul.u32 %v564_v57, %v540_v53  ;;  %v569_v6 = vmul.u32 %v565_v58, %v541_v54 }
 0x2d3   :  { %v545_v59 = vmul.u32 %v543_v56, %v540_v53  ;;  %v546_v60 = vmul.u32 %v542_v55, %v541_v54  ;;  %v544_v63 = vmul.u32 %v542_v55, %v540_v53  ;;  %v547_v1 = vmul.u32 %v543_v56, %v541_v54 }
 0x2d4   :  { %v570_v3 = vshll.u32 %v567_v61, 16  ;;  %v572_v9 = vshll.u32 %v568_v62, 16  ;;  %v571_v25 = vshrl.u32 %v567_v61, 16  ;;  %v573_v31 = vshrl.u32 %v568_v62, 16 }
 0x2d5   :  { %v548_v0 = vshll.u32 %v545_v59, 16  ;;  %v550_v4 = vshll.u32 %v546_v60, 16  ;;  %v549_v19 = vshrl.u32 %v545_v59, 16  ;;  %v551_v29 = vshrl.u32 %v546_v60, 16 }
 0x2d6   :  { %vm574_vm9 = vc.u32 %v566_v2, %v570_v3  ;;  %v576_v11 = vadd.s32 %v570_v3, %v566_v2 }
 0x2d7   :  { %vm552_vm8 = vc.u32 %v544_v63, %v548_v0  ;;  %v554_v5 = vadd.s32 %v548_v0, %v544_v63  ;;  %v575_v13 = vsel %vm574_vm9, 1, %v1007_v7 }
 0x2d8   :  { %v553_v8 = vsel %vm552_vm8, 1, %v1007_v7  ;;  %v577_v17 = vadd.s32 %v575_v13, %v569_v6  ;;  %vm578_vm11 = vc.u32 %v576_v11, %v572_v9  ;;  %v580_v34 = vadd.s32 %v576_v11, %v572_v9 }
 0x2d9   :  { %v555_v12 = vadd.s32 %v553_v8, %v547_v1  ;;  %vm556_vm10 = vc.u32 %v554_v5, %v550_v4  ;;  %v579_v24 = vsel %vm578_vm11, 1, %v1007_v7 }
 0x2da   :  { %v557_v16 = vsel %vm556_vm10, 1, %v1007_v7  ;;  %v581_v26 = vadd.s32 %v579_v24, %v577_v17 }
 0x2db   :  { %v559_v21 = vadd.s32 %v557_v16, %v555_v12 }
 0x2dc   :  { %v582_v32 = vadd.s32 %v581_v26, %v571_v25 }
 0x2dd   :  { %v560_v30 = vadd.s32 %v559_v21, %v549_v19 }
 0x2de   :  { %v583_v23 = vadd.s32 %v582_v32, %v573_v31 }
 0x2df   :  { %v561_v33 = vadd.s32 %v560_v30, %v551_v29 }
 0x2e0   :  { %v587_v35 = vadd.s32 1, %v583_v23 }
 0x2e1   :  { %vm586_vm12 = vc.u32 %v561_v33, %v580_v34  ;;  %v585_v22 = vadd.s32 %v580_v34, %v561_v33 }
 0x2e2   :  { %v588_v37 = vsel %vm586_vm12, %v587_v35, %v583_v23 }
 0x2e3   :  { %v589_v38 = vadd.s32 %v588_v37, %v584_v36 }
 0x2e5   :  { %v590_v39 = vadd.s32 536870912, %v589_v38 }
 0x2e7   :  { %v591_v41 = vshrl.u32 %v590_v39, 30 }
 0x2e9   :  { %v592_v42 = vshll.u32 %v591_v41, 30  ;;  %v615_v62 = vsub.s32 4, %v591_v41 }
 0x2eb   :  { %v593_v40 = vsub.s32 %v589_v38, %v592_v42  ;;  %v616_v2 = vsel %vm493_vm15, %v615_v62, %v591_v41 }
 0x2ec   :  { %v618_v5 = vsel %vm492_vm0, 0, %v616_v2 }
 0x2ed   :  { %vm594_vm13 = vcmp.lt.s32.totalorder %v593_v40, 0  ;;  %v595_v43 = vsub.s32 0, %v593_v40  ;;  %v635_v11 = vadd.s32 3, %v618_v5 }
 0x2ef   :  { %v596_v45 = vsel %vm594_vm13, %v595_v43, %v593_v40  ;;  %v636_v16 = vand.u32 3, %v635_v11 }
 0x2f0   :  { %v597_v46 = vclz %v596_v45 }
 0x2f1   :  { %vm638_vm1 = vcmp.eq.s32.totalorder %v636_v16, 0  ;;  %vm641_vm2 = vcmp.eq.s32.totalorder %v636_v16, 2  ;;  %vm637_vm3 = vcmp.lt.s32.totalorder %v636_v16, 2 }
 0x2f2   :  { %v806_v47 = vadd.s32 4294967294, %v597_v46 }
 0x2f4   :  { %vm807_vm14 = vcmp.lt.s32.totalorder %v806_v47, 0 }
 0x2f5   :  { %v600_v48 = vsel %vm807_vm14, 0, %v806_v47 }
 0x2f6   :  { %v601_v49 = vsub.s32 32, %v600_v48  ;;  %v605_v50 = vsub.s32 4294967266, %v600_v48  ;;  %v602_v51 = vshll.u32 %v593_v40, %v600_v48 }
 0x2f8   :  { %v603_v52 = vshrl.u32 %v585_v22, %v601_v49  ;;  %v606_v53 = vadd.s32 127, %v605_v50 }
 0x2fa   :  { %v604_v44 = vor.u32 %v603_v52, %v602_v51  ;;  %v607_v54 = vshll.u32 %v606_v53, 23 }
 0x2fc   :  { %v608_v55 = vor.u32 4788187, %v607_v54  ;;  %v611_v57 = vcvt.s32.f32 %v604_v44 }
 0x2fe   :  { %v609_v56 = vand.u32 2147483647, %v608_v55 }
 0x300   :  { %v612_v58 = vmul.f32 %v611_v57, %v609_v56 }
 0x302   :  { %v613_v59 = vxor.u32 2147483648, %v612_v58 }
 0x304   :  { %v614_v60 = vsel %vm493_vm15, %v613_v59, %v612_v58 }
 0x305   :  { %v617_v61 = vsel %vm492_vm0, %v1146_v10, %v614_v60 }
 0x306   :  { %v619_v63 = vmul.f32 %v617_v61, %v617_v61 }
 0x308   :  { %v620_v0 = vmul.f32 -0.001358992, %v619_v63  ;;  %v627_v1 = vmul.f32 -0.00019511016, %v619_v63 }
 0x30a   :  { %v621_v3 = vadd.f32 0.041655596, %v620_v0  ;;  %v628_v4 = vadd.f32 0.008332121, %v627_v1 }
 0x30c   :  { %v622_v6 = vmul.f32 %v621_v3, %v619_v63  ;;  %v629_v7 = vmul.f32 %v628_v4, %v619_v63 }
 0x30e   :  { %v623_v8 = vadd.f32 -0.4999988, %v622_v6  ;;  %v630_v9 = vadd.f32 -0.16666654, %v629_v7 }
 0x310   :  { %v624_v12 = vmul.f32 %v623_v8, %v619_v63  ;;  %v631_v13 = vmul.f32 %v630_v9, %v619_v63 }
 0x312   :  { %v625_v15 = vadd.f32 1.0, %v624_v12  ;;  %v632_v14 = vadd.f32 1.0, %v631_v13 }
 0x314   :  { %v633_v17 = vmul.f32 %v632_v14, %v617_v61  ;;  %v642_v18 = vxor.u32 2147483648, %v625_v15 }
 0x316   :  { %v639_v19 = vxor.u32 2147483648, %v633_v17  ;;  %v643_v24 = vsel %vm641_vm2, %v642_v18, %v633_v17 }
 0x318   :  { %v640_v21 = vsel %vm638_vm1, %v625_v15, %v639_v19 }
 0x319   :  { %v644_v25 = vsel %vm637_vm3, %v640_v21, %v643_v24 }
 0x31a   :  { %v645_v26 = vsel %vm634_vm5, nan, %v644_v25 }
 0x31b   :  { %647 = vst.msk [vmem:[#allocation10] sm:$0xff] %vm646_vm4, %v645_v26 }
 0x31c   :  { %658 = dma.vmem_to_hbm [thread:$0]  %s654_s9, 128, %s656_s14, [#allocation4]  }
 0x31d   :  { %990 = dma.done.wait [#allocation4], 128  }
 0x31e   :  { %991 = vsyncadd [#allocation4], 4294967168 }
 0x31f   :  { %663 = vsyncpa [#allocation3], 1 }
 0x320   :  { %664 = vsyncpa [#allocation6], 1 }
 0x321   :  { %665 = vsyncpa [#allocation9], 1 }
 0x322   :  { %666 = vsyncpa [#allocation4], 1 }

</bundles_post_ra>
